<compile_context>
chip_gen: v7x
topology: tpu7x:2x2x1
jax: 0.10.0
libtpu: 0.0.40
codegen_flags: <defaults>
</compile_context>

<pallas_src>
import functools

import jax
import jax.numpy as jnp
from jax.experimental import pallas as pl
from jax.experimental.pallas import tpu as pltpu


def _round_up(x, m):
    return (x + m - 1) // m * m


def _num_tensorcores():
    """Best-effort TensorCores-per-chip (2 on v7x, 1 on v5e/v6e)."""
    try:
        info = pltpu.get_tpu_info()
        for name in ("num_cores", "core_count", "num_tensorcores",
                     "tensorcores_per_chip", "cores_per_chip"):
            v = getattr(info, name, None)
            if isinstance(v, int) and v > 0:
                return v
    except Exception:
        pass
    try:
        if "v7" in jax.devices()[0].device_kind.lower():
            return 2
    except Exception:
        pass
    return 1


def _fusion_kernel(*refs, pack):
    # refs = (hs, ht, w2, [ones_bd], bias_smem, out)
    if pack == 1:
        hs_ref, ht_ref, w_ref, b_ref, o_ref = refs
        ones_ref = None
    else:
        hs_ref, ht_ref, w_ref, ones_ref, b_ref, o_ref = refs

    hs = hs_ref[...]                          # (bm, L), native dtype
    ht = ht_ref[...]
    ws = w_ref[0:1, :]                        # (1, L) gate weights, broadcast over rows
    wt = w_ref[1:2, :]
    b = b_ref[0]                              # f32 scalar from SMEM

    # Per-lane contribution to the gate logit (VPU, native dtype).
    prod = hs * ws + ht * wt                  # (bm, L)

    if pack == 1:
        # One D-wide segment per row: XLU cross-lane reduce, f32 accumulation.
        logit = jnp.sum(prod.astype(jnp.float32), axis=-1, keepdims=True) + b
    else:
        # `pack` D-wide segments per packed row: a single MXU matmul against a
        # constant block-diagonal ones matrix reduces every segment and scatters
        # its sum back onto its own lanes (MXU is otherwise idle here).
        logit = jnp.dot(prod, ones_ref[...],
                        preferred_element_type=jnp.float32) + b   # (bm, L)

    g = jax.nn.sigmoid(logit)                 # f32; exp on the EUP
    g = g.astype(hs.dtype)

    out = ht + g * (hs - ht)                  # == g*hs + (1-g)*ht, native-dtype VPU
    o_ref[...] = out.astype(o_ref.dtype)


def fusion_forward(h_space, h_time, weight, bias, *, row_block=4096):
    """h_space/h_time: (..., D); weight: (1, 2D) torch Linear layout; bias: (1,)."""
    orig_shape = h_space.shape
    dtype = h_space.dtype
    D = orig_shape[-1]
    assert h_time.shape == orig_shape
    assert weight.shape == (1, 2 * D)

    # Pack several D-wide rows into one 128-lane row when D divides 128 so every
    # load AND store is lane-dense (no masked vst on a narrow tail).
    pack = 128 // D if (D < 128 and 128 % D == 0) else 1
    # TODO(synk): for D < 128 that does not divide 128 (e.g. 96), stores are not
    # lane-dense; lane-padding to 128 would fix it but is not needed for D=64.
    L = pack * D
    itemsize = jnp.dtype(dtype).itemsize

    # Fold leading dims; keep the native dtype (no wrapper-side cast copies).
    hs = h_space.reshape(-1, D)
    ht = h_time.reshape(-1, D)
    M = hs.shape[0]

    # Pad only the <= pack-1 rows required for the packing reshape.
    rem = (-M) % pack
    if rem:
        hs = jnp.pad(hs, ((0, rem), (0, 0)))
        ht = jnp.pad(ht, ((0, rem), (0, 0)))
    Mp = M + rem
    M2 = Mp // pack                           # packed row count

    hs_pk = hs.reshape(M2, L)                 # contiguous reshape: pure relabel
    ht_pk = ht.reshape(M2, L)

    # Row tile: big enough to amortize per-step overhead, capped so the
    # double-buffered footprint (2 in + 1 out, x2 buffers) stays <= ~24 MiB,
    # safe for every generation including v7x's 64 MiB per-TC VMEM.
    bm_cap = max(8, ((24 << 20) // (6 * L * itemsize)) // 8 * 8)
    bm = min(row_block, bm_cap)
    if bm >= M2:
        bm = M2                               # whole problem in one block
        if _num_tensorcores() >= 2 and M2 >= 16:
            # Split so both v7x TensorCores get work (skip on single-TC chips).
            bm = _round_up(pl.cdiv(M2, 2), 8)
    grid = pl.cdiv(M2, bm)                    # ragged final block handled by Pallas

    # Gate weights: row 0 = w_s, row 1 = w_t, each tiled per packed segment.
    w = weight.reshape(2 * D)
    w2 = jnp.stack([jnp.tile(w[:D], pack),
                    jnp.tile(w[D:], pack)]).astype(dtype)          # (2, L)
    b = bias.reshape(1).astype(jnp.float32)                        # SMEM scalar

    args = [hs_pk, ht_pk, w2]
    in_specs = [
        pl.BlockSpec((bm, L), lambda i: (i, 0)),
        pl.BlockSpec((bm, L), lambda i: (i, 0)),
        pl.BlockSpec((2, L), lambda i: (0, 0)),    # constant: fetched once, reused
    ]
    if pack > 1:
        seg = jnp.arange(L) // D
        ones_bd = (seg[:, None] == seg[None, :]).astype(dtype)     # (L, L) block-diag
        args.append(ones_bd)
        in_specs.append(pl.BlockSpec((L, L), lambda i: (0, 0)))
    args.append(b)
    in_specs.append(pl.BlockSpec(memory_space=pltpu.MemorySpace.SMEM))

    kernel = functools.partial(_fusion_kernel, pack=pack)

    out_pk = pl.pallas_call(
        kernel,
        out_shape=jax.ShapeDtypeStruct((M2, L), dtype),            # native-dtype output
        grid_spec=pltpu.PrefetchScalarGridSpec(
            num_scalar_prefetch=0,
            grid=(grid,),
            in_specs=in_specs,
            out_specs=pl.BlockSpec((bm, L), lambda i: (i, 0)),
        ),
        compiler_params=pltpu.CompilerParams(
            dimension_semantics=("parallel",),
            vmem_limit_bytes=32 * 1024 * 1024),
    )(*args)

    out = out_pk.reshape(Mp, D)               # contiguous relabel
    if rem:
        out = out[:M]
    return out.reshape(orig_shape)


def fusion_reference(h_space, h_time, weight, bias):
    """Pure-JAX reference matching the PyTorch FusionModule forward."""
    combined = jnp.concatenate([h_space, h_time], axis=-1)
    g = jax.nn.sigmoid(combined @ weight.T + bias)                 # (..., 1)
    return g * h_space + (1.0 - g) * h_time


if __name__ == "__main__":
    B, N, D = 2, 16, 64          # batch, seq, input_dim (module default 64)

    key = jax.random.PRNGKey(0)
    k1, k2, k3, k4 = jax.random.split(key, 4)
    h_space = jax.random.normal(k1, (B, N, D), dtype=jnp.float32)
    h_time = jax.random.normal(k2, (B, N, D), dtype=jnp.float32)
    weight = 0.1 * jax.random.normal(k3, (1, 2 * D), dtype=jnp.float32)
    bias = 0.1 * jax.random.normal(k4, (1,), dtype=jnp.float32)

    y = fusion_forward(h_space, h_time, weight, bias)
    y = jax.block_until_ready(y)

    y_ref = fusion_reference(h_space, h_time, weight, bias)
    assert y.shape == (B, N, D)
    assert y.dtype == h_space.dtype
    assert jnp.allclose(y, y_ref, atol=1e-4, rtol=1e-4)

    print("KERNEL_OK")
</pallas_src>

<mosaic_0001>
module attributes {stable_mosaic.version = 11 : i64} {
  func.func @_fusion_kernel(%arg0: i32, %arg1: memref<16x128xf32, #tpu.memory_space<vmem>>, %arg2: memref<16x128xf32, #tpu.memory_space<vmem>>, %arg3: memref<2x128xf32, #tpu.memory_space<vmem>>, %arg4: memref<128x128xf32, #tpu.memory_space<vmem>>, %arg5: memref<1xf32, #tpu.memory_space<smem>>, %arg6: memref<16x128xf32, #tpu.memory_space<vmem>>) attributes {dimension_semantics = [#tpu.dimension_semantics<parallel>], iteration_bounds = array<i64: 1>, scalar_prefetch = 0 : i64, scratch_operands = 0 : i64, tpu.core_type = #tpu.core_type<tc>, window_params = [{transform_indices = @transform_0, window_bounds = array<i64: 16, 128>}, {transform_indices = @transform_1, window_bounds = array<i64: 16, 128>}, {pipeline_mode = #tpu.pipeline_mode<synchronous>, transform_indices = @transform_2, window_bounds = array<i64: 2, 128>}, {pipeline_mode = #tpu.pipeline_mode<synchronous>, transform_indices = @transform_3, window_bounds = array<i64: 128, 128>}, {transform_indices = @transform_4, window_bounds = array<i64: 1>}, {transform_indices = @transform_5, window_bounds = array<i64: 16, 128>}]} {
    %c0 = arith.constant 0 : index
    %c0_0 = arith.constant 0 : index
    %0 = vector.load %arg1[%c0, %c0_0] : memref<16x128xf32, #tpu.memory_space<vmem>>, vector<16x128xf32>
    %c0_1 = arith.constant 0 : index
    %c0_2 = arith.constant 0 : index
    %1 = vector.load %arg2[%c0_1, %c0_2] : memref<16x128xf32, #tpu.memory_space<vmem>>, vector<16x128xf32>
    %c0_3 = arith.constant 0 : index
    %c0_4 = arith.constant 0 : index
    %2 = vector.load %arg3[%c0_3, %c0_4] : memref<2x128xf32, #tpu.memory_space<vmem>>, vector<1x128xf32>
    %c1 = arith.constant 1 : index
    %c0_5 = arith.constant 0 : index
    %3 = vector.load %arg3[%c1, %c0_5] : memref<2x128xf32, #tpu.memory_space<vmem>>, vector<1x128xf32>
    %c0_6 = arith.constant 0 : index
    %4 = memref.load %arg5[%c0_6] : memref<1xf32, #tpu.memory_space<smem>>
    %5 = vector.broadcast %2 : vector<1x128xf32> to vector<16x128xf32>
    %6 = arith.mulf %0, %5 : vector<16x128xf32>
    %7 = vector.broadcast %3 : vector<1x128xf32> to vector<16x128xf32>
    %8 = arith.mulf %1, %7 : vector<16x128xf32>
    %9 = arith.addf %6, %8 : vector<16x128xf32>
    %c0_7 = arith.constant 0 : index
    %c0_8 = arith.constant 0 : index
    %10 = vector.load %arg4[%c0_7, %c0_8] : memref<128x128xf32, #tpu.memory_space<vmem>>, vector<128x128xf32>
    %cst = arith.constant dense<0.000000e+00> : vector<16x128xf32>
    %11 = tpu.matmul %9, %10, %cst {dimension_numbers = #tpu.dot_dimension_numbers<[1], [0], [0], [1], [0, 0, 1, 1], [], []>} : vector<16x128xf32>, vector<128x128xf32>, vector<16x128xf32> -> vector<16x128xf32>
    %12 = vector.broadcast %4 : f32 to vector<16x128xf32>
    %13 = arith.addf %11, %12 : vector<16x128xf32>
    %14 = arith.negf %13 : vector<16x128xf32>
    %15 = math.exp %14 : vector<16x128xf32>
    %cst_9 = arith.constant 1.000000e+00 : f32
    %16 = vector.broadcast %cst_9 : f32 to vector<16x128xf32>
    %17 = arith.addf %16, %15 : vector<16x128xf32>
    %18 = arith.divf %16, %17 : vector<16x128xf32>
    %19 = arith.subf %0, %1 : vector<16x128xf32>
    %20 = arith.mulf %18, %19 : vector<16x128xf32>
    %21 = arith.addf %1, %20 : vector<16x128xf32>
    %c0_10 = arith.constant 0 : index
    %c0_11 = arith.constant 0 : index
    %22 = vector.load %arg6[%c0_10, %c0_11] : memref<16x128xf32, #tpu.memory_space<vmem>>, vector<16x128xf32>
    tpu.vector_store %arg6[%c0_10, %c0_11], %21 {strides = array<i32>} : memref<16x128xf32, #tpu.memory_space<vmem>>, vector<16x128xf32>,
    return
  }
  func.func @transform_0(%arg0: i32) -> (i32, i32) {
    %c0_i32 = arith.constant 0 : i32
    %c0_i32_0 = arith.constant 0 : i32
    return %arg0, %c0_i32 : i32, i32
  }
  func.func @transform_1(%arg0: i32) -> (i32, i32) {
    %c0_i32 = arith.constant 0 : i32
    %c0_i32_0 = arith.constant 0 : i32
    return %arg0, %c0_i32 : i32, i32
  }
  func.func @transform_2(%arg0: i32) -> (i32, i32) {
    %c0_i32 = arith.constant 0 : i32
    %c0_i32_0 = arith.constant 0 : i32
    %c0_i32_1 = arith.constant 0 : i32
    return %c0_i32, %c0_i32_0 : i32, i32
  }
  func.func @transform_3(%arg0: i32) -> (i32, i32) {
    %c0_i32 = arith.constant 0 : i32
    %c0_i32_0 = arith.constant 0 : i32
    %c0_i32_1 = arith.constant 0 : i32
    return %c0_i32, %c0_i32_0 : i32, i32
  }
  func.func @transform_4(%arg0: i32) -> i32 {
    %c0_i32 = arith.constant 0 : i32
    %c0_i32_0 = arith.constant 0 : i32
    return %c0_i32 : i32
  }
  func.func @transform_5(%arg0: i32) -> (i32, i32) {
    %c0_i32 = arith.constant 0 : i32
    %c0_i32_0 = arith.constant 0 : i32
    return %arg0, %c0_i32 : i32, i32
  }
}

</mosaic_0001>

<bundles_post_ra>
// kernel: tpu_custom_call.1
= control target key start
LH: loop header
LB: loop body
LE: loop exit
PB: predicated region body
PF: predicated region fallthrough
CT: control target
= control target key end

     0   :  { %11 = vsyncpa [#allocation4], 0  ;;  %s532_s0 = inlined_call_operand.hbm [shape: f32[16,128], index: 0, kind: input, shape index: {}]   ;;  %s533_s1 = inlined_call_operand.hbm [shape: f32[16,128], index: 1, kind: input, shape index: {}]   ;;  %s534_s2 = inlined_call_operand.vmem [shape: f32[2,128], index: 2, kind: input, shape index: {}]   ;;  %s535_s3 = inlined_call_operand.hbm [shape: f32[128,128], index: 3, kind: input, shape index: {}]   ;;  %s536_s4 = inlined_call_operand.<no memory space> [shape: f32[1], index: 4, kind: input, shape index: {}]   ;;  %s537_s5 = inlined_call_operand.hbm [shape: f32[16,128], index: 5, kind: output, shape index: {}]  }
   0x1   :  { %12 = vsyncpa [#allocation7], 0 }
   0x2   :  { %13 = vsyncpa [#allocation5], 0  ;;  %s411_s18 = smov [#allocation6]   ;;  %s412_s20 = smov [#allocation3]  }
   0x3   :  { %s31_s19 = sshll.u32 %s411_s18, 4  ;;  %s19_s21 = sshll.u32 %s412_s20, 4  ;;  %s32_s19 = int_to_ptr.vmem [resolvable:$true] %s31_s19  ;;  %s447_s21 = int_to_ptr.vmem [resolvable:$true] %s19_s21 }
   0x4   :  { %s317_s24 = scalar_lea.hbm %s533_s1, 256 }
   0x5   :  { %p318_p0 = scmp.ne.s32.totalorder %s533_s1, %s317_s24  ;;  %p321_p1 = scmp.lt.u32.totalorder %s317_s24, %s533_s1 }
   0x7   :  { %p323_p2 = pnand %p321_p1, %p318_p0 }
   0x9   :  { %326 = shalt.err (!%p323_p2)
}
   0xa   :  { %s327_s29 = scalar_lea.vmem %s32_s19, 256  ;;  %p332_p4 = scmp.lt.s32.totalorder %s32_s19, %s32_s19 }
   0xb   :  { %p328_p3 = scmp.ne.s32.totalorder %s32_s19, %s327_s29  ;;  %p333_p5 = scmp.lt.s32.totalorder %s327_s29, %s327_s29 }
   0xd   :  { %p334_p6 = por %p333_p5, %p332_p4 }
   0xf   :  { %p335_p7 = pnand %p334_p6, %p328_p3 }
  0x11   :  { %338 = shalt.err (!%p335_p7)
}
  0x12   :  { %s413_s30 = smov 128   ;;  %s414_s6 = smov 8  }
  0x13   :  { %37 = dma.hbm_to_vmem [thread:$0]  %s533_s1, 256, %s32_s19, [#allocation7], %s413_s30, %s413_s30, %s414_s6  }
  0x14   :  { %s339_s11 = scalar_lea.hbm %s532_s0, 256 }
  0x15   :  { %p340_p8 = scmp.ne.s32.totalorder %s532_s0, %s339_s11  ;;  %p343_p9 = scmp.lt.u32.totalorder %s339_s11, %s532_s0 }
  0x17   :  { %p345_p10 = pnand %p343_p9, %p340_p8 }
  0x19   :  { %348 = shalt.err (!%p345_p10)
}
  0x1a   :  { %s349_s16 = scalar_lea.vmem %s447_s21, 256  ;;  %p354_p12 = scmp.lt.s32.totalorder %s447_s21, %s447_s21 }
  0x1b   :  { %p350_p11 = scmp.ne.s32.totalorder %s447_s21, %s349_s16  ;;  %p355_p13 = scmp.lt.s32.totalorder %s349_s16, %s349_s16 }
  0x1d   :  { %p356_p0 = por %p355_p13, %p354_p12 }
  0x1f   :  { %p357_p1 = pnand %p356_p0, %p350_p11 }
  0x21   :  { %360 = shalt.err (!%p357_p1)
}
  0x22   :  { %25 = dma.hbm_to_vmem [thread:$0]  %s532_s0, 256, %s447_s21, [#allocation4], %s413_s30, %s413_s30, %s414_s6  }
  0x23   :  { %s415_s18 = smov [#allocation8]   ;;  %s361_s23 = scalar_lea.hbm %s535_s3, 2048 }
  0x24   :  { %s45_s19 = sshll.u32 %s415_s18, 4  ;;  %p362_p2 = scmp.ne.s32.totalorder %s535_s3, %s361_s23  ;;  %s46_s19 = int_to_ptr.vmem [resolvable:$true] %s45_s19 }
  0x25   :  { %p365_p3 = scmp.lt.u32.totalorder %s361_s23, %s535_s3 }
  0x27   :  { %p367_p4 = pnand %p365_p3, %p362_p2 }
  0x29   :  { %370 = shalt.err (!%p367_p4)
}
  0x2a   :  { %s371_s28 = scalar_lea.vmem %s46_s19, 2048  ;;  %p376_p6 = scmp.lt.s32.totalorder %s46_s19, %s46_s19 }
  0x2b   :  { %p372_p5 = scmp.ne.s32.totalorder %s46_s19, %s371_s28  ;;  %p377_p7 = scmp.lt.s32.totalorder %s371_s28, %s371_s28 }
  0x2d   :  { %p378_p8 = por %p377_p7, %p376_p6 }
  0x2f   :  { %p379_p9 = pnand %p378_p8, %p372_p5 }
  0x31   :  { %382 = shalt.err (!%p379_p9)
}
  0x32   :  { %51 = dma.hbm_to_vmem [thread:$0]  %s535_s3, 2048, %s46_s19, [#allocation7], %s413_s30, %s413_s30, %s414_s6  }
  0x33   :  { %405 = dma.done.wait [#allocation4], 256  }
  0x34   :  { %406 = vsyncadd [#allocation4], 4294967040 }
  0x35   :  { %407 = dma.done.wait [#allocation7], 2304  }
  0x36   :  { %408 = vsyncadd [#allocation7], 4294964992  ;;  %v84_v0 = vld [vmem:[#allocation8] sm:$0xff]  ;;  %v85_v1 = vld [vmem:[#allocation8 + $0x8] sm:$0xff]  ;;  %v100_v36 = vstv %s536_s4  ;;  %s416_s4 = smov [#allocation9]  }
  0x37   :  { %v86_v2 = vld [vmem:[#allocation8 + $0x10] sm:$0xff]  ;;  %v271_v3 = vpack.c.bf16 %v85_v1, %v84_v0  ;;  %v87_v4 = vld [vmem:[#allocation8 + $0x18] sm:$0xff]  ;;  %v88_v6 = vld [vmem:[#allocation8 + $0x20] sm:$0xff]  ;;  %s201_s10 = sshll.u32 %s416_s4, 4  ;;  %s202_s10 = int_to_ptr.vmem [resolvable:$true] %s201_s10 }
  0x38   :  { %v275_v5 = vpack.c.bf16 %v87_v4, %v86_v2  ;;  %v89_v7 = vld [vmem:[#allocation8 + $0x28] sm:$0xff]  ;;  %v90_v9 = vld [vmem:[#allocation8 + $0x30] sm:$0xff]  ;;  %v499_v10 = vld [vmem:[#allocation3] sm:$0xff]  ;;  %s383_s11 = scalar_lea.vmem %s202_s10, 256  ;;  %p388_p11 = scmp.lt.s32.totalorder %s202_s10, %s202_s10 }
  0x39   :  { %272 = vmatprep.subr.bf16.mxu0 %v271_v3  ;;  %v279_v8 = vpack.c.bf16 %v89_v7, %v88_v6  ;;  %v91_v11 = vld [vmem:[#allocation8 + $0x38] sm:$0xff]  ;;  %v501_v12 = vld [vmem:[#allocation6] sm:$0xff]  ;;  %v214_v13 = vld [vmem:[%s534_s2] ss:$0 sm:$0xff]  ;;  %p384_p10 = scmp.ne.s32.totalorder %s202_s10, %s383_s11  ;;  %p389_p12 = scmp.lt.s32.totalorder %s383_s11, %s383_s11 }
  0x3a   :  { %274 = vmatpush3.bf16.msra.mxu0 %v271_v3  ;;  %v215_v14 = vld [vmem:[%s534_s2 + $0x1] ss:$0 sm:$0xff]  ;;  %v74_v15 = vmul.f32 %v214_v13, %v499_v10  ;;  %v283_v17 = vpack.c.bf16 %v91_v11, %v90_v9  ;;  %v93_v19 = vld [vmem:[#allocation8 + $0x48] sm:$0xff]  ;;  %v94_v22 = vld [vmem:[#allocation8 + $0x50] sm:$0xff]  ;;  %v188_v48 = vsub.f32 %v499_v10, %v501_v12 }
  0x3b   :  { %276 = vmatprep.subr.bf16.mxu0 %v275_v5  ;;  %v80_v16 = vmul.f32 %v215_v14, %v501_v12  ;;  %v92_v18 = vld [vmem:[#allocation8 + $0x40] sm:$0xff]  ;;  %v95_v23 = vld [vmem:[#allocation8 + $0x58] sm:$0xff]  ;;  %v97_v26 = vld [vmem:[#allocation8 + $0x68] sm:$0xff]  ;;  %p390_p13 = por %p389_p12, %p388_p11 }
  0x3c   :  { %v287_v21 = vpack.c.bf16 %v93_v19, %v92_v18  ;;  %v291_v24 = vpack.c.bf16 %v95_v23, %v94_v22  ;;  %v96_v25 = vld [vmem:[#allocation8 + $0x60] sm:$0xff]  ;;  %v98_v28 = vld [vmem:[#allocation8 + $0x70] sm:$0xff]  ;;  %v99_v29 = vld [vmem:[#allocation8 + $0x78] sm:$0xff] }
  0x3d   :  { %v82_v20 = vadd.f32 %v80_v16, %v74_v15  ;;  %v295_v27 = vpack.c.bf16 %v97_v26, %v96_v25  ;;  %v64_v30 = vld [vmem:[#allocation3 + $0x8] sm:$0xff]  ;;  %v66_v31 = vld [vmem:[#allocation6 + $0x8] sm:$0xff]  ;;  %v299_v32 = vpack.c.bf16 %v99_v29, %v98_v28  ;;  %p391_p0 = pnand %p390_p13, %p384_p10 }
  0x3e   :  { %278 = vmatpush3.bf16.msra.mxu0 %v275_v5  ;;  %v75_v33 = vmul.f32 %v214_v13, %v64_v30  ;;  %v81_v34 = vmul.f32 %v215_v14, %v66_v31  ;;  %v189_v47 = vsub.f32 %v64_v30, %v66_v31 }
  0x3f   :  { %280 = vmatprep.subr.bf16.mxu0 %v279_v8  ;;  %268 = vmatprep.mubr.f32.mxu0 %v82_v20 }
  0x40   :  { %v83_v35 = vadd.f32 %v81_v34, %v75_v33 }
  0x42   :  { %282 = vmatpush3.bf16.msra.mxu0 %v279_v8 }
  0x43   :  { %284 = vmatprep.subr.bf16.mxu0 %v283_v17 }
  0x46   :  { %286 = vmatpush3.bf16.msra.mxu0 %v283_v17 }
  0x47   :  { %288 = vmatprep.subr.bf16.mxu0 %v287_v21 }
  0x4a   :  { %290 = vmatpush3.bf16.msra.mxu0 %v287_v21 }
  0x4b   :  { %292 = vmatprep.subr.bf16.mxu0 %v291_v24 }
  0x4e   :  { %294 = vmatpush3.bf16.msra.mxu0 %v291_v24 }
  0x4f   :  { %296 = vmatprep.subr.bf16.mxu0 %v295_v27 }
  0x52   :  { %298 = vmatpush3.bf16.msra.mxu0 %v295_v27 }
  0x53   :  { %300 = vmatprep.subr.bf16.mxu0 %v299_v32 }
  0x56   :  { %302 = vmatpush3.bf16.msra.mxu0 %v299_v32 }
  0x59   :  { %269 = vmatmul.mubr.f32.vlgmr.msra.gmra.mrb[0].mxu0 %v83_v35 }
 0x12c   :  { %v270_v37 = vpop.f32.mrb[0].mxu0 }
 0x12d   :  { %v173_v38 = vadd.f32 %v270_v37, %v100_v36  ;;  %v167_v39 = vpop.f32.mrb[1].mxu0 }
 0x12e   :  { %v168_v40 = vadd.f32 %v167_v39, %v100_v36 }
 0x12f   :  { %v217_v41 = vmul.f32 -1.442695, %v173_v38 }
 0x130   :  { %v216_v42 = vmul.f32 -1.442695, %v168_v40 }
 0x131   :  { %309 = vpow2.f32 %v217_v41 }
 0x132   :  { %311 = vpow2.f32 %v216_v42 }
 0x13b   :  { %v310_v43 = vpop.eup %309 }
 0x13c   :  { %v312_v44 = vpop.eup %311  ;;  %v183_v45 = vadd.f32 1.0, %v310_v43 }
 0x13d   :  { %v182_v46 = vadd.f32 1.0, %v312_v44 }
 0x13e   :  { %313 = vrcp.f32 %v183_v45 }
 0x13f   :  { %315 = vrcp.f32 %v182_v46 }
 0x148   :  { %v314_v49 = vpop.eup %313 }
 0x149   :  { %v316_v50 = vpop.eup %315  ;;  %v191_v51 = vmul.f32 %v314_v49, %v189_v47 }
 0x14a   :  { %v190_v52 = vmul.f32 %v316_v50, %v188_v48 }
 0x14b   :  { %v193_v53 = vadd.f32 %v191_v51, %v66_v31 }
 0x14c   :  { %v192_v54 = vadd.f32 %v190_v52, %v501_v12 }
 0x14d   :  { %195 = vst [vmem:[#allocation9 + $0x8] sm:$0xff] %v193_v53 }
 0x14e   :  { %194 = vst [vmem:[#allocation9] sm:$0xff] %v192_v54 }
 0x14f   :  { %394 = shalt.err (!%p391_p0)
}
 0x150   :  { %s395_s14 = scalar_lea.hbm %s537_s5, 256 }
 0x151   :  { %p396_p1 = scmp.ne.s32.totalorder %s537_s5, %s395_s14  ;;  %p399_p2 = scmp.lt.u32.totalorder %s395_s14, %s537_s5 }
 0x153   :  { %p401_p3 = pnand %p399_p2, %p396_p1 }
 0x155   :  { %404 = shalt.err (!%p401_p3)
}
 0x156   :  { %207 = dma.vmem_to_hbm [thread:$0]  %s202_s10, 256, %s537_s5, [#allocation5], %s413_s30, %s413_s30, %s414_s6  }
 0x157   :  { %409 = dma.done.wait [#allocation5], 256  }
 0x158   :  { %410 = vsyncadd [#allocation5], 4294967040 }
 0x159   :  { %211 = vsyncpa [#allocation4], 1 }
 0x15a   :  { %212 = vsyncpa [#allocation7], 1 }
 0x15b   :  { %213 = vsyncpa [#allocation5], 1 }

</bundles_post_ra>
